<compile_context>
chip_gen: v7x
topology: tpu7x:2x2x1
jax: 0.10.0
libtpu: 0.0.40
codegen_flags: <defaults>
</compile_context>

<pallas_src>
import functools

import jax
import jax.numpy as jnp
from jax import lax
from jax.experimental import pallas as pl
from jax.experimental.pallas import tpu as pltpu


# --------------------------------------------------------------------------
# Tile-size policy
# --------------------------------------------------------------------------
_MAX_BLOCK_N = 1024          # per-step overhead already amortized beyond this
_BLOCK_C = 2048              # class tile for the C-tiled path (multiple of 128)
_SWEET_TILE_BYTES = 16 * 1024 * 1024   # combined pred+label tile sweet spot (~8 MiB each)


def _round_up(x, m):
    return ((x + m - 1) // m) * m


def _vmem_budgets():
    """Generation-aware (tile_budget, vmem_limit) in bytes.

    v5e / v6e have 128 MiB physical VMEM per core -> use it (bigger full-C
    coverage, bigger batch tiles).  v7x has 64 MiB per TensorCore -> keep the
    conservative caps.  Falls back to the conservative pair if the query is
    unavailable.
    """
    cap = None
    try:
        cap = getattr(pltpu.get_tpu_info(), "vmem_capacity_bytes", None)
    except Exception:
        cap = None
    if cap is None:
        cap = 64 * 1024 * 1024
    if cap >= 96 * 1024 * 1024:                       # v5e / v6e (128 MiB)
        limit = min(cap - 28 * 1024 * 1024, 100 * 1024 * 1024)
        budget = 64 * 1024 * 1024
    else:                                             # v7x (64 MiB / TC) or unknown
        limit = min(48 * 1024 * 1024, (3 * cap) // 4)
        budget = limit // 2
    return budget, limit


def _sublane_pack(*dtypes):
    """Smallest legal batch-tile multiple given packed input dtypes."""
    min_itemsize = min(jnp.dtype(d).itemsize for d in dtypes)
    return max(8, 32 // max(1, min_itemsize))  # f32->8, bf16->16, int8/fp8->32


def _tile_fits(bn, bc, in_bytes, budget):
    # 2 pipeline buffers per input + ~4 f32-sized temporaries in the body.
    return bn * bc * (2 * in_bytes + 4 * 4) <= budget


def _pick_block_n(n, block_c, in_bytes, pack, tile_budget):
    """Batch-tile rows: as big as VMEM allows, but prefer >= 4 even grid steps.

    Even step counts balance v7x's two TensorCores on the 'parallel' batch
    axis; >= 4 steps hide the prologue/epilogue DMA.  Per-input tiles are
    kept in the ~8 MiB sweet spot (already ~85% of HBM roofline).
    """
    n_pad = _round_up(n, pack)
    u = n_pad // pack                                    # batch extent in pack units
    bytes_per_unit = pack * block_c * (2 * in_bytes + 4 * 4)
    k_budget = max(1, tile_budget // max(1, bytes_per_unit))
    k_sweet = max(1, _SWEET_TILE_BYTES // max(1, pack * block_c * in_bytes))
    k_cap = max(1, min(k_budget, k_sweet, _MAX_BLOCK_N // pack, u))

    min_steps = -(-u // k_cap)                           # fewest steps the caps allow
    target = max(min_steps, 4 if u >= 4 else 1)
    if target % 2 == 1 and target < u:                   # even step count when possible
        target += 1
    target = min(target, u)
    k = max(1, -(-u // target))
    return k * pack


# --------------------------------------------------------------------------
# Kernels
# --------------------------------------------------------------------------
def _mix_ce_full_c_kernel(pred_ref, label_ref, loss_ref):
    """One batch tile, full class axis resident.

    loss = (row_max + lse) * sum(label) - sum(pred * label)
    which equals -sum(log_softmax(pred) * label) without materializing a
    (bn, C) log_softmax temporary.  Padded batch rows (edge block) may hold
    garbage; all ops are row-independent and Pallas clips the writeback.
    """
    pred = pred_ref[...].astype(jnp.float32)     # (bn, C)
    label = label_ref[...].astype(jnp.float32)   # (bn, C)

    row_max = jnp.max(pred, axis=1, keepdims=True)                          # (bn, 1)
    lse = jnp.log(jnp.sum(jnp.exp(pred - row_max), axis=1, keepdims=True))  # (bn, 1)
    s_label = jnp.sum(label, axis=1, keepdims=True)                         # (bn, 1)
    s_dot = jnp.sum(pred * label, axis=1, keepdims=True)                    # (bn, 1)

    loss_ref[...] = (row_max + lse) * s_label - s_dot


def _mix_ce_c_tiled_kernel(pred_ref, label_ref, loss_ref,
                           m_ref, l_ref, slab_ref, sdot_ref,
                           *, num_classes, block_c, needs_mask):
    """C-tiled path: online max/LSE + running sum(label), sum(pred*label).

    Interior class tiles are mask-free; only the last (ragged) tile masks its
    padded lanes, and only when `needs_mask` (num_classes % block_c != 0).
    """
    k = pl.program_id(1)
    k_last = pl.num_programs(1) - 1

    @pl.when(k == 0)
    def _init():
        m_ref[...] = jnp.full_like(m_ref, -jnp.inf)
        l_ref[...] = jnp.zeros_like(l_ref)
        slab_ref[...] = jnp.zeros_like(slab_ref)
        sdot_ref[...] = jnp.zeros_like(sdot_ref)

    pred = pred_ref[...].astype(jnp.float32)     # (bn, bc)
    label = label_ref[...].astype(jnp.float32)   # (bn, bc)

    def step(pred_t, label_t, prod_t):
        tile_max = jnp.max(pred_t, axis=1, keepdims=True)
        m_new = jnp.maximum(m_ref[...], tile_max)
        alpha = jnp.exp(m_ref[...] - m_new)
        l_new = alpha * l_ref[...] + jnp.sum(jnp.exp(pred_t - m_new),
                                             axis=1, keepdims=True)
        slab_new = slab_ref[...] + jnp.sum(label_t, axis=1, keepdims=True)
        sdot_new = sdot_ref[...] + jnp.sum(prod_t, axis=1, keepdims=True)
        m_ref[...] = m_new
        l_ref[...] = l_new
        slab_ref[...] = slab_new
        sdot_ref[...] = sdot_new

        @pl.when(k == k_last)
        def _finalize():
            loss_ref[...] = (m_new + jnp.log(l_new)) * slab_new - sdot_new

    if needs_mask:
        @pl.when(k != k_last)
        def _interior():                 # interior tiles: no masking at all
            step(pred, label, pred * label)

        @pl.when(k == k_last)
        def _edge():                     # ragged last tile: mask padded lanes
            rem = num_classes % block_c  # > 0 because needs_mask
            valid = lax.broadcasted_iota(jnp.int32, (1, block_c), 1) < rem
            step(jnp.where(valid, pred, -jnp.inf),   # exp() -> 0 on padding
                 jnp.where(valid, label, 0.0),
                 jnp.where(valid, pred * label, 0.0))
    else:
        step(pred, label, pred * label)


# --------------------------------------------------------------------------
# pallas_call wrappers
# --------------------------------------------------------------------------
def _loss_full_c(pred, label, block_n, vmem_limit):
    n, c = pred.shape
    out = pl.pallas_call(
        _mix_ce_full_c_kernel,
        out_shape=jax.ShapeDtypeStruct((n, 1), jnp.float32),
        grid_spec=pltpu.PrefetchScalarGridSpec(
            num_scalar_prefetch=0,
            grid=(pl.cdiv(n, block_n),),
            in_specs=[
                pl.BlockSpec((block_n, c), lambda i: (i, 0)),
                pl.BlockSpec((block_n, c), lambda i: (i, 0)),
            ],
            out_specs=pl.BlockSpec((block_n, 1), lambda i: (i, 0)),
        ),
        compiler_params=pltpu.CompilerParams(
            dimension_semantics=("parallel",),
            vmem_limit_bytes=vmem_limit),
    )(pred, label)
    return out[:, 0]


def _loss_c_tiled(pred, label, block_n, block_c, vmem_limit):
    n, c = pred.shape
    kernel = functools.partial(_mix_ce_c_tiled_kernel, num_classes=c,
                               block_c=block_c,
                               needs_mask=(c % block_c != 0))
    out = pl.pallas_call(
        kernel,
        out_shape=jax.ShapeDtypeStruct((n, 1), jnp.float32),
        grid_spec=pltpu.PrefetchScalarGridSpec(
            num_scalar_prefetch=0,
            grid=(pl.cdiv(n, block_n), pl.cdiv(c, block_c)),
            in_specs=[
                pl.BlockSpec((block_n, block_c), lambda i, k: (i, k)),
                pl.BlockSpec((block_n, block_c), lambda i, k: (i, k)),
            ],
            out_specs=pl.BlockSpec((block_n, 1), lambda i, k: (i, 0)),
            # Note: 4 separate (bn,1) refs each lane-pad to 128; a single
            # lane-packed buffer would save ~1.5 MiB at bn=1024 but needs
            # minor-dim concat / offset stores -- kept separate for safety.
            scratch_shapes=[pltpu.VMEM((block_n, 1), jnp.float32)] * 4,
        ),
        compiler_params=pltpu.CompilerParams(
            dimension_semantics=("parallel", "arbitrary"),
            vmem_limit_bytes=vmem_limit),
    )(pred, label)
    return out[:, 0]


def _per_sample_loss(pred, label, *, block_n=None, block_c=None,
                     force_c_tiled=False):
    """Per-sample mix cross-entropy losses, shape (N,), float32.

    Streams pred/label in their native storage dtype; casts to f32 in-kernel.
    """
    n, c = pred.shape
    assert label.shape == (n, c), (pred.shape, label.shape)

    tile_budget, vmem_limit = _vmem_budgets()
    in_bytes = jnp.dtype(pred.dtype).itemsize + jnp.dtype(label.dtype).itemsize
    pack = _sublane_pack(pred.dtype, label.dtype)

    if not force_c_tiled:
        if block_n is not None:
            return _loss_full_c(pred, label, block_n, vmem_limit)
        bn = _pick_block_n(n, c, in_bytes, pack, tile_budget)
        # Prefer the single-pass full-C kernel whenever its tile fits: it does
        # strictly less VALU/EUP work per element than the online-LSE path.
        if _tile_fits(bn, c, in_bytes, tile_budget):
            return _loss_full_c(pred, label, bn, vmem_limit)

    bc = block_c if block_c is not None else min(_BLOCK_C, _round_up(c, 128))
    bn = block_n if block_n is not None else _pick_block_n(n, bc, in_bytes,
                                                           pack, tile_budget)
    return _loss_c_tiled(pred, label, bn, bc, vmem_limit)


# --------------------------------------------------------------------------
# Module wrapper (weight / reduction / loss_weight glue in plain JAX)
# --------------------------------------------------------------------------
class MixCrossEntropyLoss:
    """JAX/Pallas port of the PyTorch MixCrossEntropyLoss module."""

    def __init__(self, reduction="mean", loss_weight=1.0):
        self.reduction = reduction
        self.loss_weight = loss_weight

    def __call__(self, pred, label, weight=None, avg_factor=None,
                 reduction_override=None, block_n=None, block_c=None):
        assert reduction_override in (None, "none", "mean", "sum")
        reduction = reduction_override if reduction_override else self.reduction

        loss = _per_sample_loss(pred, label, block_n=block_n, block_c=block_c)

        # weight_reduce_loss semantics (tiny (N,) vector math -> plain JAX).
        if weight is not None:
            loss = loss * weight.astype(jnp.float32)

        if avg_factor is None:
            if reduction == "mean":
                loss = jnp.mean(loss)
            elif reduction == "sum":
                loss = jnp.sum(loss)
            # 'none' -> keep per-sample vector
        else:
            if reduction == "mean":
                loss = jnp.sum(loss) / avg_factor
            elif reduction != "none":
                raise ValueError("avg_factor can not be used with reduction='sum'")

        return self.loss_weight * loss


# --------------------------------------------------------------------------
# Pure-JAX reference + self-test
# --------------------------------------------------------------------------
def _reference(pred, label, reduction="mean", loss_weight=1.0):
    logp = jax.nn.log_softmax(pred.astype(jnp.float32), axis=1)
    loss = -jnp.sum(logp * label.astype(jnp.float32), axis=1)
    if reduction == "mean":
        loss = jnp.mean(loss)
    elif reduction == "sum":
        loss = jnp.sum(loss)
    return loss_weight * loss


if __name__ == "__main__":
    key = jax.random.PRNGKey(0)
    keys = jax.random.split(key, 9)

    module = MixCrossEntropyLoss(reduction="mean", loss_weight=1.0)

    # --- small f32 example (full-C fast path) ---------------------------------
    N, C = 16, 32
    pred = jax.random.normal(keys[0], (N, C), dtype=jnp.float32)
    raw = jax.random.uniform(keys[1], (N, C), dtype=jnp.float32)
    label = raw / jnp.sum(raw, axis=1, keepdims=True)   # mixup-style soft labels

    out = jax.block_until_ready(module(pred, label))
    ref = _reference(pred, label, reduction="mean")
    assert jnp.allclose(out, ref, rtol=1e-4, atol=1e-4), (out, ref)

    out_none = jax.block_until_ready(module(pred, label, reduction_override="none"))
    ref_none = _reference(pred, label, reduction="none")
    assert jnp.allclose(out_none, ref_none, rtol=1e-4, atol=1e-4)

    out_sum = jax.block_until_ready(module(pred, label, reduction_override="sum"))
    assert jnp.allclose(out_sum, _reference(pred, label, reduction="sum"),
                        rtol=1e-4, atol=1e-4)

    # --- per-sample weight + avg_factor ---------------------------------------
    w = jax.random.uniform(keys[2], (N,), dtype=jnp.float32)
    out_w = jax.block_until_ready(module(pred, label, weight=w, avg_factor=5.0))
    ref_w = jnp.sum(_reference(pred, label, reduction="none") * w) / 5.0
    assert jnp.allclose(out_w, ref_w, rtol=1e-4, atol=1e-4), (out_w, ref_w)

    # --- bf16 inputs streamed natively (16-row sublane packing) ---------------
    N2, C2 = 32, 48
    pred_bf = jax.random.normal(keys[3], (N2, C2), dtype=jnp.float32).astype(jnp.bfloat16)
    raw2 = jax.random.uniform(keys[4], (N2, C2), dtype=jnp.float32)
    label_bf = (raw2 / jnp.sum(raw2, axis=1, keepdims=True)).astype(jnp.bfloat16)

    out_bf = jax.block_until_ready(module(pred_bf, label_bf, reduction_override="none"))
    ref_bf = _reference(pred_bf.astype(jnp.float32), label_bf.astype(jnp.float32),
                        reduction="none")
    assert jnp.allclose(out_bf, ref_bf, rtol=1e-3, atol=1e-3)

    # --- force the C-tiled online-LSE path: ragged N and C (edge-tile masking) -
    N3, C3 = 20, 300
    pred3 = jax.random.normal(keys[5], (N3, C3), dtype=jnp.float32)
    raw3 = jax.random.uniform(keys[6], (N3, C3), dtype=jnp.float32)
    label3 = raw3 / jnp.sum(raw3, axis=1, keepdims=True)

    out3 = jax.block_until_ready(
        _per_sample_loss(pred3, label3, block_n=8, block_c=128, force_c_tiled=True))
    ref3 = _reference(pred3, label3, reduction="none")
    assert jnp.allclose(out3, ref3, rtol=1e-4, atol=1e-4), (out3, ref3)

    # --- force the C-tiled path with C % block_c == 0 (mask-free interior) ----
    N4, C4 = 24, 256
    pred4 = jax.random.normal(keys[7], (N4, C4), dtype=jnp.float32)
    raw4 = jax.random.uniform(keys[8], (N4, C4), dtype=jnp.float32)
    label4 = raw4 / jnp.sum(raw4, axis=1, keepdims=True)

    out4 = jax.block_until_ready(
        _per_sample_loss(pred4, label4, block_c=128, force_c_tiled=True))
    ref4 = _reference(pred4, label4, reduction="none")
    assert jnp.allclose(out4, ref4, rtol=1e-4, atol=1e-4), (out4, ref4)

    print("KERNEL_OK")
</pallas_src>

<mosaic_0001>
module attributes {stable_mosaic.version = 11 : i64} {
  func.func @_mix_ce_full_c_kernel(%arg0: i32, %arg1: memref<8x32xf32, #tpu.memory_space<vmem>>, %arg2: memref<8x32xf32, #tpu.memory_space<vmem>>, %arg3: memref<8x1xf32, #tpu.memory_space<vmem>>) attributes {dimension_semantics = [#tpu.dimension_semantics<parallel>], iteration_bounds = array<i64: 2>, scalar_prefetch = 0 : i64, scratch_operands = 0 : i64, tpu.core_type = #tpu.core_type<tc>, window_params = [{transform_indices = @transform_0, window_bounds = array<i64: 8, 32>}, {transform_indices = @transform_1, window_bounds = array<i64: 8, 32>}, {transform_indices = @transform_2, window_bounds = array<i64: 8, 1>}]} {
    %c0 = arith.constant 0 : index
    %c0_0 = arith.constant 0 : index
    %0 = vector.load %arg1[%c0, %c0_0] : memref<8x32xf32, #tpu.memory_space<vmem>>, vector<8x32xf32>
    %c0_1 = arith.constant 0 : index
    %c0_2 = arith.constant 0 : index
    %1 = vector.load %arg2[%c0_1, %c0_2] : memref<8x32xf32, #tpu.memory_space<vmem>>, vector<8x32xf32>
    %cst = arith.constant dense<0xFF800000> : vector<8xf32>
    %2 = vector.multi_reduction <maximumf>, %0, %cst [1] : vector<8x32xf32> to vector<8xf32>
    %3 = vector.shape_cast %2 : vector<8xf32> to vector<8x1xf32>
    %4 = vector.broadcast %3 : vector<8x1xf32> to vector<8x32xf32>
    %5 = arith.subf %0, %4 : vector<8x32xf32>
    %6 = math.exp %5 : vector<8x32xf32>
    %cst_3 = arith.constant dense<0.000000e+00> : vector<8xf32>
    %7 = vector.multi_reduction <add>, %6, %cst_3 [1] : vector<8x32xf32> to vector<8xf32>
    %8 = vector.shape_cast %7 : vector<8xf32> to vector<8x1xf32>
    %9 = math.log %8 : vector<8x1xf32>
    %cst_4 = arith.constant dense<0.000000e+00> : vector<8xf32>
    %10 = vector.multi_reduction <add>, %1, %cst_4 [1] : vector<8x32xf32> to vector<8xf32>
    %11 = vector.shape_cast %10 : vector<8xf32> to vector<8x1xf32>
    %12 = arith.mulf %0, %1 : vector<8x32xf32>
    %cst_5 = arith.constant dense<0.000000e+00> : vector<8xf32>
    %13 = vector.multi_reduction <add>, %12, %cst_5 [1] : vector<8x32xf32> to vector<8xf32>
    %14 = vector.shape_cast %13 : vector<8xf32> to vector<8x1xf32>
    %15 = arith.addf %3, %9 : vector<8x1xf32>
    %16 = arith.mulf %15, %11 : vector<8x1xf32>
    %17 = arith.subf %16, %14 : vector<8x1xf32>
    %c0_6 = arith.constant 0 : index
    %c0_7 = arith.constant 0 : index
    %18 = vector.load %arg3[%c0_6, %c0_7] : memref<8x1xf32, #tpu.memory_space<vmem>>, vector<8x1xf32>
    tpu.vector_store %arg3[%c0_6, %c0_7], %17 {strides = array<i32>} : memref<8x1xf32, #tpu.memory_space<vmem>>, vector<8x1xf32>,
    return
  }
  func.func @transform_0(%arg0: i32) -> (i32, i32) {
    %c0_i32 = arith.constant 0 : i32
    %c0_i32_0 = arith.constant 0 : i32
    return %arg0, %c0_i32 : i32, i32
  }
  func.func @transform_1(%arg0: i32) -> (i32, i32) {
    %c0_i32 = arith.constant 0 : i32
    %c0_i32_0 = arith.constant 0 : i32
    return %arg0, %c0_i32 : i32, i32
  }
  func.func @transform_2(%arg0: i32) -> (i32, i32) {
    %c0_i32 = arith.constant 0 : i32
    %c0_i32_0 = arith.constant 0 : i32
    return %arg0, %c0_i32 : i32, i32
  }
}

</mosaic_0001>

<bundles_post_ra>
// kernel: tpu_custom_call.1
= control target key start
LH: loop header
LB: loop body
LE: loop exit
PB: predicated region body
PF: predicated region fallthrough
CT: control target
= control target key end

     0   :  { %7 = vsyncpa [#allocation3], 0  ;;  %s642_s0 = inlined_call_operand.hbm [shape: f32[16,32], index: 0, kind: input, shape index: {}]   ;;  %s643_s1 = inlined_call_operand.hbm [shape: f32[16,32], index: 1, kind: input, shape index: {}]   ;;  %s644_s2 = inlined_call_operand.vmem [shape: f32[16,1], index: 2, kind: output, shape index: {}]  }
   0x1   :  { %9 = vsyncpa [#allocation3 + $0x1], 0 }
   0x2   :  { %10 = vsyncpa [#allocation5], 0 }
   0x3   :  { %12 = vsyncpa [#allocation5 + $0x1], 0  ;;  %s488_s9 = smov 0   ;;  %s490_s10 = smov 0  }
   0x4   :  { %s492_s11 = smov 0   ;;  %s494_s12 = smov 0  }
   0x5 LB: > { %s507_s13 = sadd.s32 4294967295, %s469_s12   ;;  %s510_s14 = sadd.s32 1, %s469_s12   ;;  %s469_s12 = sphi %s494_s12, %s656_s12   ;;  %s465_s11 = sphi %s492_s11, %s655_s11   ;;  %s461_s10 = sphi %s490_s10, %s654_s10   ;;  %s457_s9 = sphi %s488_s9, %s653_s9  }
   0x6   : > { %s22_s15 = ssub.s32 %s469_s12, %s510_s14  ;;  %s25_s16 = sadd.s32 1, %s465_s11 }
   0x7   : > { %p23_p0 = scmp.eq.s32.totalorder %s22_s15, 0  ;;  %p32_p1 = scmp.ne.s32.totalorder %s465_s11, %s461_s10 }
   0x8   : > { %p33_p2 = scmp.eq.s32.totalorder %s469_s12, 0  ;;  %p38_p3 = scmp.ne.s32.totalorder %s461_s10, %s457_s9 }
   0x9   : > { %s520_s17 = scalar_select %p23_p0, %s465_s11, %s25_s16  }
   0xa   : > { %p34_p4 = por %p33_p2, %p32_p1  ;;  %p39_p5 = scmp.eq.s32.totalorder %s507_s13, 0 }
   0xb   : > { %p334_p6 = scmp.lt.s32.totalorder %s469_s12, 2  ;;  %s529_s19 = sand.u32 1, %s465_s11  }
   0xc   : > { %p524_p7 = por %p39_p5, %p38_p3  ;;  %s313_s20 = sshll.u32 %s529_s19, 3 }
   0xd   : > { %s314_s21 = sshll.u32 %s469_s12, 7  ;;  %s118_s25 = scalar_lea.vmem [#allocation2], %s313_s20 }
   0xe   : > { %s646_s18 = scalar_select %p524_p7, 1, 0 }
   0xf   : > { %s538_s24 = scalar_lea.hbm %s642_s0, %s314_s21  ;;  %s125_s26 = sshll.u32 %s118_s25, 4  ;;  %s542_s26 = int_to_ptr.vmem [resolvable:$true] %s125_s26 }
  0x10   : > { %p544_p8 = pnand %p334_p6, %p34_p4  ;;  %s115_s28 = scalar_lea.sflag [#allocation3], %s529_s19 }
  0x11   : > { %s371_s29 = scalar_lea.hbm %s538_s24, 128  ;;  %s376_s4 = scalar_lea.hbm %s642_s0, 256 }
  0x12   : > { %p372_p11 = scmp.ne.s32.totalorder %s538_s24, %s371_s29  ;;  %p373_p12 = pneg %p544_p8 }
  0x13   : > { %p377_p1 = scmp.lt.u32.totalorder %s538_s24, %s642_s0  ;;  %p378_p2 = scmp.lt.u32.totalorder %s376_s4, %s371_s29 }
  0x14   : > { %p374_p13 = pnand %p373_p12, %p372_p11  ;;  %p380_p4 = scmp.lt.u32.totalorder %s371_s29, %s538_s24 }
  0x15   : > { %p379_p3 = por %p378_p2, %p377_p1 }
  0x16   : > { %p375_p0 = pneg %p374_p13 }
  0x17   : > { %p381_p5 = por %p380_p4, %p379_p3 }
  0x19   : > { %p382_p6 = pnand %p381_p5, %p375_p0 }
  0x1b   : > { %385 = shalt.err (!%p382_p6)
}
  0x1c   : > { %s386_s7 = scalar_lea.vmem %s542_s26, 128  ;;  %s471_s8 = smov [#allocation2]  }
  0x1d   : > { %p387_p11 = scmp.ne.s32.totalorder %s542_s26, %s386_s7  ;;  %s391_s9 = sshll.u32 %s471_s8, 4  ;;  %s392_s9 = int_to_ptr.vmem [resolvable:$false] %s391_s9 }
  0x1e   : > { %s393_s15 = scalar_lea.vmem %s392_s9, 256  ;;  %p394_p10 = scmp.lt.s32.totalorder %s542_s26, %s392_s9 }
  0x1f   : > { %p389_p13 = pnand %p387_p11, %p373_p12  ;;  %p395_p1 = scmp.lt.s32.totalorder %s393_s15, %s386_s7 }
  0x21   : > { %p390_p9 = pneg %p389_p13  ;;  %p396_p2 = por %p395_p1, %p394_p10 }
  0x23   : > { %p397_p3 = pnand %p396_p2, %p390_p9 }
  0x25   : > { %400 = shalt.err (!%p397_p3)
}
  0x26   : > { %330 = dma.hbm_to_vmem [thread:$0]  (!%p544_p8), %s538_s24, 128, %s542_s26, %s115_s28  }
  0x27   : > { %p648_p0 = scmp.lt.s32.totalorder %s469_s12, 3  ;;  %p649_p4 = scmp.ge.s32.totalorder %s469_s12, 1 }
  0x28   : > { %s589_s25 = scalar_lea.hbm %s643_s1, %s314_s21  ;;  %s136_s29 = scalar_lea.vmem [#allocation4], %s313_s20 }
  0x29   : > { %p580_p5 = pnand %p649_p4, %p648_p0  ;;  %s143_s30 = sshll.u32 %s136_s29, 4  ;;  %s144_s30 = int_to_ptr.vmem [resolvable:$true] %s143_s30 }
  0x2a   : > { %s133_s24 = scalar_lea.sflag [#allocation5], %s529_s19  ;;  %s401_s26 = scalar_lea.hbm %s589_s25, 128 }
  0x2b   : > { %s650_s16 = scalar_select %p580_p5, 1, 0 }
  0x2c   : > { %p402_p9 = scmp.ne.s32.totalorder %s589_s25, %s401_s26  ;;  %s406_s21 = scalar_lea.hbm %s643_s1, 256 }
  0x2d   : > { %p407_p11 = scmp.lt.u32.totalorder %s589_s25, %s643_s1  ;;  %p408_p13 = scmp.lt.u32.totalorder %s406_s21, %s401_s26 }
  0x2e   : > { %p404_p10 = pnand %p402_p9, %p373_p12  ;;  %p410_p2 = scmp.lt.u32.totalorder %s401_s26, %s589_s25 }
  0x2f   : > { %p409_p1 = por %p408_p13, %p407_p11 }
  0x30   : > { %p405_p6 = pneg %p404_p10 }
  0x31   : > { %p411_p3 = por %p410_p2, %p409_p1 }
  0x33   : > { %p412_p0 = pnand %p411_p3, %p405_p6 }
  0x35   : > { %415 = shalt.err (!%p412_p0)
}
  0x36   : > { %s416_s19 = scalar_lea.vmem %s144_s30, 128  ;;  %s472_s20 = smov [#allocation4]  }
  0x37   : > { %p417_p4 = scmp.ne.s32.totalorder %s144_s30, %s416_s19  ;;  %s421_s5 = sshll.u32 %s472_s20, 4  ;;  %s422_s5 = int_to_ptr.vmem [resolvable:$false] %s421_s5 }
  0x38   : > { %s423_s6 = scalar_lea.vmem %s422_s5, 256  ;;  %p424_p7 = scmp.lt.s32.totalorder %s144_s30, %s422_s5 }
  0x39   : > { %p419_p9 = pnand %p417_p4, %p373_p12  ;;  %p425_p5 = scmp.lt.s32.totalorder %s423_s6, %s416_s19 }
  0x3b   : > { %p420_p10 = pneg %p419_p9  ;;  %p426_p11 = por %p425_p5, %p424_p7 }
  0x3d   : > { %p427_p13 = pnand %p426_p11, %p420_p10 }
  0x3f   : > { %430 = shalt.err (!%p427_p13)
}
  0x40   : > { %333 = dma.hbm_to_vmem [thread:$0]  (!%p544_p8), %s589_s25, 128, %s144_s30, %s133_s24  }
  0x41   : > { %p651_p6 = scmp.ne.s32.totalorder %s650_s16, 0 }
  0x42   : > { %s154_s7 = sand.u32 (!%p651_p6), 1, %s461_s10   ;;  %p652_p12 = scmp.ne.s32.totalorder (!%p651_p6), %s646_s18, 0 }
  0x43   : > { %152 = sbr.rel (%p651_p6) target bundleno = 399 (0x18f), region = 28  ;;  %s318_s8 = sshll.u32 (!%p651_p6), %s154_s7, 3 }
  0x44   : > { %s155_s9 = scalar_lea.sflag (!%p651_p6), [#allocation3], %s154_s7  ;;  %s158_s15 = scalar_lea.vmem (!%p651_p6), [#allocation2], %s318_s8 }
  0x4a   : > { %448 = dma.done.wait (%p652_p12), %s155_s9, 128  }
  0x4b   : > { %450 = vsyncadd (%p652_p12), %s155_s9, 4294967168  ;;  %s164_s22 = scalar_lea.sflag [#allocation5], %s154_s7  ;;  %s167_s23 = scalar_lea.vmem [#allocation4], %s318_s8 }
  0x4c   : > { %452 = dma.done.wait (%p652_p12), %s164_s22, 128  }
  0x4d   : > { %454 = vsyncadd (%p652_p12), %s164_s22, 4294967168  ;;  %vm198_vm0 = vcmask 261120   ;;  %v196_v0 = vld [vmem:[%s158_s15] sm:$0xff]  ;;  %v197_v2 = vld [vmem:[%s167_s23] sm:$0xff]  ;;  %p192_p7 = scmp.lt.s32.totalorder %s507_s13, 1  ;;  %vm220_vm1 = vcmask 7168  }
  0x4e   : > { %v199_v1 = vsel %vm198_vm0, %v196_v0, -inf  ;;  %v210_v3 = vsel %vm198_vm0, %v197_v2, 0.0  ;;  %v213_v4 = vmul.f32 %v197_v2, %v196_v0 }
  0x4f   : > { %200 = vmax.xlane.f32.xlu0 %v199_v1  ;;  %211 = vadd.xlane.f32.xlu1 %v210_v3  ;;  %s658_s13 = smov (!%p192_p7, %s507_s13), 1 }
  0x50   : > { %v214_v5 = vsel %vm198_vm0, %v213_v4, 0.0  ;;  %s320_s18 = sshll.u32 %s658_s13, 3 }
  0x51   : > { %s195_s25 = scalar_lea.vmem %s644_s2, %s320_s18 }
  0x53   : > { %215 = vadd.xlane.f32.xlu1 %v214_v5 }
  0xdc   : > { %v201_v6 = vpop.xlane.xlu0 %200  ;;  %v212_v12 = vpop.xlane.xlu1 %211 }
  0xdd   : > { %v202_v7 = vsub.f32 %v196_v0, %v201_v6 }
  0xdf   : > { %v203_v8 = vmul.f32 1.442695, %v202_v7 }
  0xe0   : > { %v216_v16 = vpop.xlane.xlu1 %215 }
  0xe1   : > { %367 = vpow2.f32 %v203_v8 }
  0xeb   : > { %v368_v9 = vpop.eup %367 }
  0xec   : > { %v205_v10 = vsel %vm198_vm0, %v368_v9, 0.0 }
  0xed   : > { %206 = vadd.xlane.f32.xlu0 %v205_v10 }
 0x17a   : > { %v207_v11 = vpop.xlane.xlu0 %206 }
 0x17b   : > { %369 = vlog2.f32 %v207_v11 }
 0x185   : > { %v370_v13 = vpop.eup %369 }
 0x186   : > { %v209_v14 = vmul.f32 0.6931472, %v370_v13 }
 0x188   : > { %v217_v15 = vadd.f32 %v209_v14, %v201_v6 }
 0x18a   : > { %v218_v17 = vmul.f32 %v217_v15, %v212_v12 }
 0x18c   : > { %v219_v18 = vsub.f32 %v218_v17, %v216_v16 }
 0x18e   : > { %221 = vst.msk [vmem:[%s195_s25] sm:$0xff] %vm220_vm1, %v219_v18 }
 0x18f PF: > { %p15_p8 = scmp.ge.s32.totalorder %s510_s14, 4   ;;  %s653_s9 = smov %s461_s10 }
 0x190   : > { %s654_s10 = smov %s465_s11  ;;  %s655_s11 = smov %s520_s17 }
 0x191   : > { %s656_s12 = smov %s510_s14  ;;  %17 = sbr.rel (!%p15_p8) target bundleno = 5 (0x5), region = 81 }
 0x198   :  { %241 = vsyncpa [#allocation3], 1 }
 0x199   :  { %243 = vsyncpa [#allocation3 + $0x1], 1 }
 0x19a   :  { %244 = vsyncpa [#allocation5], 1 }
 0x19b   :  { %246 = vsyncpa [#allocation5 + $0x1], 1 }

</bundles_post_ra>
